<compile_context>
chip_gen: v5e
topology: v5e:2x2
jax: 0.10.0
libtpu: 0.0.40
codegen_flags: <defaults>
</compile_context>

<pallas_src>
import jax
import jax.numpy as jnp
from jax import lax
from jax.experimental import pallas as pl
from jax.experimental.pallas import tpu as pltpu


def _linear_gather_kernel(ind_ref, x_ref, w_ref, out_ref):
    # ind_ref: VMEM (E, K, 1) int32   gather indices for this batch
    # x_ref:   VMEM (T, I)   f32      activations for this batch
    # w_ref:   VMEM (E, I, J) f32     full projection weight (resident)
    # out_ref: VMEM (E, K, J) f32     gathered projections for this batch
    E, K, _ = ind_ref.shape
    T = x_ref.shape[0]

    x = x_ref[...]                                            # (T, I)
    # Column index along T, shared by all heads.
    col_t = lax.broadcasted_iota(jnp.int32, (K, T), 1)        # (K, T)

    # E is a small static Python int -> unrolled at trace time.
    for e in range(E):
        idx = ind_ref[e]                                      # (K, 1) int32
        # One-hot row selector; OOB indices yield an all-zero row (safe).
        onehot = (col_t == idx).astype(x.dtype)               # (K, T)
        # Gather the K needed rows of X via the MXU (vectorized, no scalar loop).
        xg = jnp.dot(onehot, x, preferred_element_type=jnp.float32)        # (K, I)
        # Project only the gathered rows: K*I*J FLOPs instead of T*I*J.
        y = jnp.dot(xg, w_ref[e], preferred_element_type=jnp.float32)      # (K, J)
        out_ref[e, :, :] = y.astype(out_ref.dtype)


def linear_gather(x, w_eij, ind):
    """x: (B, T, I) f32, w_eij: (E, I, J) f32, ind: (B, E, K) int -> (B, E, K, J) f32."""
    B, T, I = x.shape
    E, I2, J = w_eij.shape
    assert I == I2
    K = ind.shape[2]

    # (B, E, K, 1) so the index tile rides into VMEM with full trailing dims.
    ind4 = ind.astype(jnp.int32).reshape(B, E, K, 1)

    grid_spec = pltpu.PrefetchScalarGridSpec(
        num_scalar_prefetch=0,
        grid=(B,),
        in_specs=[
            # indices for batch b
            pl.BlockSpec((pl.Squeezed(), E, K, 1), lambda b: (b, 0, 0, 0)),
            # activations for batch b
            pl.BlockSpec((pl.Squeezed(), T, I), lambda b: (b, 0, 0)),
            # full weight, constant block index -> loaded once, stays resident
            pl.BlockSpec((E, I, J), lambda b: (0, 0, 0)),
        ],
        out_specs=pl.BlockSpec(
            (pl.Squeezed(), E, K, J), lambda b: (b, 0, 0, 0)
        ),
    )

    return pl.pallas_call(
        _linear_gather_kernel,
        out_shape=jax.ShapeDtypeStruct((B, E, K, J), jnp.float32),
        grid_spec=grid_spec,
        compiler_params=pltpu.CompilerParams(
            dimension_semantics=("parallel",)
        ),
    )(ind4, x, w_eij)


if __name__ == "__main__":
    # Small shapes consistent with the module: B=2, T=8, I=32, E=4, J=16, K=4
    B, T, I, E, J, K = 2, 8, 32, 4, 16, 4

    key = jax.random.PRNGKey(0)
    k1, k2, k3 = jax.random.split(key, 3)

    x = jax.random.normal(k1, (B, T, I), dtype=jnp.float32)

    # Torch-style Linear weight of shape (E*J, I); convert to (E, I, J):
    #   w_eij[e, i, j] = w_torch[e*J + j, i]
    w_torch = 0.1 * jax.random.normal(k2, (E * J, I), dtype=jnp.float32)
    w_eij = jnp.transpose(w_torch.reshape(E, J, I), (0, 2, 1))

    ind = jax.random.randint(k3, (B, E, K), 0, T, dtype=jnp.int32)

    out = linear_gather(x, w_eij, ind)
    out = jax.block_until_ready(out)

    # Pure-JAX reference mirroring the PyTorch forward
    y = jnp.einsum("bti,eij->betj", x, w_eij)              # (B, E, T, J)
    ref = jnp.take_along_axis(y, ind[..., None], axis=2)   # (B, E, K, J)

    assert out.shape == (B, E, K, J), out.shape
    assert jnp.allclose(out, ref, atol=1e-5, rtol=1e-5)
    print("KERNEL_OK")
</pallas_src>

<mosaic_0001>
module attributes {stable_mosaic.version = 11 : i64} {
  func.func @_linear_gather_kernel(%arg0: i32, %arg1: memref<1x4x4x1xi32, #tpu.memory_space<vmem>>, %arg2: memref<1x8x32xf32, #tpu.memory_space<vmem>>, %arg3: memref<4x32x16xf32, #tpu.memory_space<vmem>>, %arg4: memref<1x4x4x16xf32, #tpu.memory_space<vmem>>) attributes {dimension_semantics = [#tpu.dimension_semantics<parallel>], iteration_bounds = array<i64: 2>, scalar_prefetch = 0 : i64, scratch_operands = 0 : i64, tpu.core_type = #tpu.core_type<tc>, window_params = [{transform_indices = @transform_0, window_bounds = array<i64: 1, 4, 4, 1>}, {transform_indices = @transform_1, window_bounds = array<i64: 1, 8, 32>}, {pipeline_mode = #tpu.pipeline_mode<synchronous>, transform_indices = @transform_2, window_bounds = array<i64: 4, 32, 16>}, {transform_indices = @transform_3, window_bounds = array<i64: 1, 4, 4, 16>}]} {
    %c0 = arith.constant 0 : index
    %c0_0 = arith.constant 0 : index
    %c0_1 = arith.constant 0 : index
    %0 = vector.load %arg2[%c0, %c0_0, %c0_1] : memref<1x8x32xf32, #tpu.memory_space<vmem>>, vector<1x8x32xf32>
    %1 = vector.shape_cast %0 : vector<1x8x32xf32> to vector<8x32xf32>
    %2 = tpu.iota {dimensions = array<i32: 1>} : vector<4x8xi32>
    %c0_2 = arith.constant 0 : index
    %c0_3 = arith.constant 0 : index
    %c0_4 = arith.constant 0 : index
    %c0_5 = arith.constant 0 : index
    %3 = vector.load %arg1[%c0_2, %c0_3, %c0_4, %c0_5] : memref<1x4x4x1xi32, #tpu.memory_space<vmem>>, vector<1x1x4x1xi32>
    %4 = vector.shape_cast %3 : vector<1x1x4x1xi32> to vector<4x1xi32>
    %5 = vector.broadcast %4 : vector<4x1xi32> to vector<4x8xi32>
    %6 = arith.cmpi eq, %2, %5 : vector<4x8xi32>
    %7 = arith.extui %6 : vector<4x8xi1> to vector<4x8xi32>
    %8 = arith.sitofp %7 : vector<4x8xi32> to vector<4x8xf32>
    %cst = arith.constant dense<0.000000e+00> : vector<4x32xf32>
    %9 = tpu.matmul %8, %1, %cst {dimension_numbers = #tpu.dot_dimension_numbers<[1], [0], [0], [1], [0, 0, 1, 1], [], []>} : vector<4x8xf32>, vector<8x32xf32>, vector<4x32xf32> -> vector<4x32xf32>
    %c0_6 = arith.constant 0 : index
    %c0_7 = arith.constant 0 : index
    %c0_8 = arith.constant 0 : index
    %10 = vector.load %arg3[%c0_6, %c0_7, %c0_8] : memref<4x32x16xf32, #tpu.memory_space<vmem>>, vector<1x32x16xf32>
    %11 = vector.shape_cast %10 : vector<1x32x16xf32> to vector<32x16xf32>
    %cst_9 = arith.constant dense<0.000000e+00> : vector<4x16xf32>
    %12 = tpu.matmul %9, %11, %cst_9 {dimension_numbers = #tpu.dot_dimension_numbers<[1], [0], [0], [1], [0, 0, 1, 1], [], []>} : vector<4x32xf32>, vector<32x16xf32>, vector<4x16xf32> -> vector<4x16xf32>
    %c0_10 = arith.constant 0 : index
    %c0_11 = arith.constant 0 : index
    %c0_12 = arith.constant 0 : index
    %c0_13 = arith.constant 0 : index
    %13 = vector.load %arg4[%c0_10, %c0_11, %c0_12, %c0_13] : memref<1x4x4x16xf32, #tpu.memory_space<vmem>>, vector<1x1x4x16xf32>
    %14 = vector.shape_cast %13 : vector<1x1x4x16xf32> to vector<4x16xf32>
    %15 = vector.shape_cast %12 : vector<4x16xf32> to vector<1x1x4x16xf32>
    tpu.vector_store %arg4[%c0_10, %c0_11, %c0_12, %c0_13], %15 {strides = array<i32>} : memref<1x4x4x16xf32, #tpu.memory_space<vmem>>, vector<1x1x4x16xf32>,
    %c0_14 = arith.constant 0 : index
    %c1 = arith.constant 1 : index
    %c0_15 = arith.constant 0 : index
    %c0_16 = arith.constant 0 : index
    %16 = vector.load %arg1[%c0_14, %c1, %c0_15, %c0_16] : memref<1x4x4x1xi32, #tpu.memory_space<vmem>>, vector<1x1x4x1xi32>
    %17 = vector.shape_cast %16 : vector<1x1x4x1xi32> to vector<4x1xi32>
    %18 = vector.broadcast %17 : vector<4x1xi32> to vector<4x8xi32>
    %19 = arith.cmpi eq, %2, %18 : vector<4x8xi32>
    %20 = arith.extui %19 : vector<4x8xi1> to vector<4x8xi32>
    %21 = arith.sitofp %20 : vector<4x8xi32> to vector<4x8xf32>
    %cst_17 = arith.constant dense<0.000000e+00> : vector<4x32xf32>
    %22 = tpu.matmul %21, %1, %cst_17 {dimension_numbers = #tpu.dot_dimension_numbers<[1], [0], [0], [1], [0, 0, 1, 1], [], []>} : vector<4x8xf32>, vector<8x32xf32>, vector<4x32xf32> -> vector<4x32xf32>
    %c1_18 = arith.constant 1 : index
    %c0_19 = arith.constant 0 : index
    %c0_20 = arith.constant 0 : index
    %23 = vector.load %arg3[%c1_18, %c0_19, %c0_20] : memref<4x32x16xf32, #tpu.memory_space<vmem>>, vector<1x32x16xf32>
    %24 = vector.shape_cast %23 : vector<1x32x16xf32> to vector<32x16xf32>
    %cst_21 = arith.constant dense<0.000000e+00> : vector<4x16xf32>
    %25 = tpu.matmul %22, %24, %cst_21 {dimension_numbers = #tpu.dot_dimension_numbers<[1], [0], [0], [1], [0, 0, 1, 1], [], []>} : vector<4x32xf32>, vector<32x16xf32>, vector<4x16xf32> -> vector<4x16xf32>
    %c0_22 = arith.constant 0 : index
    %c1_23 = arith.constant 1 : index
    %c0_24 = arith.constant 0 : index
    %c0_25 = arith.constant 0 : index
    %26 = vector.load %arg4[%c0_22, %c1_23, %c0_24, %c0_25] : memref<1x4x4x16xf32, #tpu.memory_space<vmem>>, vector<1x1x4x16xf32>
    %27 = vector.shape_cast %26 : vector<1x1x4x16xf32> to vector<4x16xf32>
    %28 = vector.shape_cast %25 : vector<4x16xf32> to vector<1x1x4x16xf32>
    tpu.vector_store %arg4[%c0_22, %c1_23, %c0_24, %c0_25], %28 {strides = array<i32>} : memref<1x4x4x16xf32, #tpu.memory_space<vmem>>, vector<1x1x4x16xf32>,
    %c0_26 = arith.constant 0 : index
    %c2 = arith.constant 2 : index
    %c0_27 = arith.constant 0 : index
    %c0_28 = arith.constant 0 : index
    %29 = vector.load %arg1[%c0_26, %c2, %c0_27, %c0_28] : memref<1x4x4x1xi32, #tpu.memory_space<vmem>>, vector<1x1x4x1xi32>
    %30 = vector.shape_cast %29 : vector<1x1x4x1xi32> to vector<4x1xi32>
    %31 = vector.broadcast %30 : vector<4x1xi32> to vector<4x8xi32>
    %32 = arith.cmpi eq, %2, %31 : vector<4x8xi32>
    %33 = arith.extui %32 : vector<4x8xi1> to vector<4x8xi32>
    %34 = arith.sitofp %33 : vector<4x8xi32> to vector<4x8xf32>
    %cst_29 = arith.constant dense<0.000000e+00> : vector<4x32xf32>
    %35 = tpu.matmul %34, %1, %cst_29 {dimension_numbers = #tpu.dot_dimension_numbers<[1], [0], [0], [1], [0, 0, 1, 1], [], []>} : vector<4x8xf32>, vector<8x32xf32>, vector<4x32xf32> -> vector<4x32xf32>
    %c2_30 = arith.constant 2 : index
    %c0_31 = arith.constant 0 : index
    %c0_32 = arith.constant 0 : index
    %36 = vector.load %arg3[%c2_30, %c0_31, %c0_32] : memref<4x32x16xf32, #tpu.memory_space<vmem>>, vector<1x32x16xf32>
    %37 = vector.shape_cast %36 : vector<1x32x16xf32> to vector<32x16xf32>
    %cst_33 = arith.constant dense<0.000000e+00> : vector<4x16xf32>
    %38 = tpu.matmul %35, %37, %cst_33 {dimension_numbers = #tpu.dot_dimension_numbers<[1], [0], [0], [1], [0, 0, 1, 1], [], []>} : vector<4x32xf32>, vector<32x16xf32>, vector<4x16xf32> -> vector<4x16xf32>
    %c0_34 = arith.constant 0 : index
    %c2_35 = arith.constant 2 : index
    %c0_36 = arith.constant 0 : index
    %c0_37 = arith.constant 0 : index
    %39 = vector.load %arg4[%c0_34, %c2_35, %c0_36, %c0_37] : memref<1x4x4x16xf32, #tpu.memory_space<vmem>>, vector<1x1x4x16xf32>
    %40 = vector.shape_cast %39 : vector<1x1x4x16xf32> to vector<4x16xf32>
    %41 = vector.shape_cast %38 : vector<4x16xf32> to vector<1x1x4x16xf32>
    tpu.vector_store %arg4[%c0_34, %c2_35, %c0_36, %c0_37], %41 {strides = array<i32>} : memref<1x4x4x16xf32, #tpu.memory_space<vmem>>, vector<1x1x4x16xf32>,
    %c0_38 = arith.constant 0 : index
    %c3 = arith.constant 3 : index
    %c0_39 = arith.constant 0 : index
    %c0_40 = arith.constant 0 : index
    %42 = vector.load %arg1[%c0_38, %c3, %c0_39, %c0_40] : memref<1x4x4x1xi32, #tpu.memory_space<vmem>>, vector<1x1x4x1xi32>
    %43 = vector.shape_cast %42 : vector<1x1x4x1xi32> to vector<4x1xi32>
    %44 = vector.broadcast %43 : vector<4x1xi32> to vector<4x8xi32>
    %45 = arith.cmpi eq, %2, %44 : vector<4x8xi32>
    %46 = arith.extui %45 : vector<4x8xi1> to vector<4x8xi32>
    %47 = arith.sitofp %46 : vector<4x8xi32> to vector<4x8xf32>
    %cst_41 = arith.constant dense<0.000000e+00> : vector<4x32xf32>
    %48 = tpu.matmul %47, %1, %cst_41 {dimension_numbers = #tpu.dot_dimension_numbers<[1], [0], [0], [1], [0, 0, 1, 1], [], []>} : vector<4x8xf32>, vector<8x32xf32>, vector<4x32xf32> -> vector<4x32xf32>
    %c3_42 = arith.constant 3 : index
    %c0_43 = arith.constant 0 : index
    %c0_44 = arith.constant 0 : index
    %49 = vector.load %arg3[%c3_42, %c0_43, %c0_44] : memref<4x32x16xf32, #tpu.memory_space<vmem>>, vector<1x32x16xf32>
    %50 = vector.shape_cast %49 : vector<1x32x16xf32> to vector<32x16xf32>
    %cst_45 = arith.constant dense<0.000000e+00> : vector<4x16xf32>
    %51 = tpu.matmul %48, %50, %cst_45 {dimension_numbers = #tpu.dot_dimension_numbers<[1], [0], [0], [1], [0, 0, 1, 1], [], []>} : vector<4x32xf32>, vector<32x16xf32>, vector<4x16xf32> -> vector<4x16xf32>
    %c0_46 = arith.constant 0 : index
    %c3_47 = arith.constant 3 : index
    %c0_48 = arith.constant 0 : index
    %c0_49 = arith.constant 0 : index
    %52 = vector.load %arg4[%c0_46, %c3_47, %c0_48, %c0_49] : memref<1x4x4x16xf32, #tpu.memory_space<vmem>>, vector<1x1x4x16xf32>
    %53 = vector.shape_cast %52 : vector<1x1x4x16xf32> to vector<4x16xf32>
    %54 = vector.shape_cast %51 : vector<4x16xf32> to vector<1x1x4x16xf32>
    tpu.vector_store %arg4[%c0_46, %c3_47, %c0_48, %c0_49], %54 {strides = array<i32>} : memref<1x4x4x16xf32, #tpu.memory_space<vmem>>, vector<1x1x4x16xf32>,
    return
  }
  func.func @transform_0(%arg0: i32) -> (i32, i32, i32, i32) {
    %c0_i32 = arith.constant 0 : i32
    %c0_i32_0 = arith.constant 0 : i32
    %c0_i32_1 = arith.constant 0 : i32
    %c0_i32_2 = arith.constant 0 : i32
    return %arg0, %c0_i32, %c0_i32_0, %c0_i32_1 : i32, i32, i32, i32
  }
  func.func @transform_1(%arg0: i32) -> (i32, i32, i32) {
    %c0_i32 = arith.constant 0 : i32
    %c0_i32_0 = arith.constant 0 : i32
    %c0_i32_1 = arith.constant 0 : i32
    return %arg0, %c0_i32, %c0_i32_0 : i32, i32, i32
  }
  func.func @transform_2(%arg0: i32) -> (i32, i32, i32) {
    %c0_i32 = arith.constant 0 : i32
    %c0_i32_0 = arith.constant 0 : i32
    %c0_i32_1 = arith.constant 0 : i32
    %c0_i32_2 = arith.constant 0 : i32
    return %c0_i32, %c0_i32_0, %c0_i32_1 : i32, i32, i32
  }
  func.func @transform_3(%arg0: i32) -> (i32, i32, i32, i32) {
    %c0_i32 = arith.constant 0 : i32
    %c0_i32_0 = arith.constant 0 : i32
    %c0_i32_1 = arith.constant 0 : i32
    %c0_i32_2 = arith.constant 0 : i32
    return %arg0, %c0_i32, %c0_i32_0, %c0_i32_1 : i32, i32, i32, i32
  }
}

</mosaic_0001>

<bundles_post_ra>
// kernel: tpu_custom_call.1
= control target key start
LH: loop header
LB: loop body
LE: loop exit
PB: predicated region body
PF: predicated region fallthrough
CT: control target
= control target key end

     0   :  { %8 = vsyncpa [#allocation3], 0  ;;  %s849_s0 = inlined_call_operand.vmem [shape: s32[2,4,4,1], index: 0, kind: input, shape index: {}]   ;;  %s850_s1 = inlined_call_operand.vmem [shape: f32[2,8,32], index: 1, kind: input, shape index: {}]   ;;  %s851_s2 = inlined_call_operand.vmem [shape: f32[4,32,16], index: 2, kind: input, shape index: {}]   ;;  %s852_s3 = inlined_call_operand.hbm [shape: f32[2,4,4,16], index: 3, kind: output, shape index: {}]  }
   0x1   :  { %10 = vsyncpa [#allocation3 + $0x1], 0  ;;  %s701_s12 = smov 0   ;;  %s703_s13 = smov 0  }
   0x2   :  { %s705_s14 = smov 0   ;;  %s707_s15 = smov 0  }
   0x3 LB: > { %s722_s16 = sadd.s32 4294967295, %s675_s15   ;;  %s523_s17 = sadd.s32 4294967294, %s675_s15   ;;  %s675_s15 = sphi %s707_s15, %s858_s15   ;;  %s671_s14 = sphi %s705_s14, %s857_s14   ;;  %s667_s13 = sphi %s703_s13, %s856_s13   ;;  %s663_s12 = sphi %s701_s12, %s855_s12  }
   0x4   : > { %s726_s18 = sadd.s32 1, %s675_s15   ;;  %s96_s19 = sadd.s32 1, %s671_s14 }
   0x5   : > { %s93_s20 = ssub.s32 %s675_s15, %s726_s18  ;;  %p106_p0 = scmp.ne.s32.totalorder %s671_s14, %s667_s13 }
   0x6   : > { %p94_p1 = scmp.eq.s32.totalorder %s93_s20, 0  ;;  %p107_p2 = scmp.eq.s32.totalorder %s722_s16, 1 }
   0x7   : > { %p112_p3 = scmp.ne.s32.totalorder %s667_s13, %s663_s12  ;;  %p113_p4 = scmp.eq.s32.totalorder %s523_s17, 1 }
   0x8   : > { %s737_s21 = scalar_select %p94_p1, %s671_s14, %s96_s19  }
   0x9   : > { %p739_p5 = por %p107_p2, %p106_p0  ;;  %p743_p6 = por %p113_p4, %p112_p3 }
   0xa   : > { %p526_p7 = scmp.ge.s32.totalorder %s675_s15, 1  ;;  %p149_p8 = scmp.lt.s32.totalorder %s675_s15, 3 }
   0xc   : > { %p150_p9 = pnand %p526_p7, %p149_p8 }
   0xd   : > { %p177_p10 = scmp.lt.s32.totalorder (!%p150_p9), %s722_s16, 1 }
   0xe   : > { %153 = sbr.rel (%p150_p9) target bundleno = 537 (0x219), region = 32 }
  0x13   : > { %v677_v0 = vmov 0   ;;  %s178_s24 = scalar_select %p177_p10, %s722_s16, 1  ;;  %v187_v6 = vlaneseq  ;;  %vm196_vm0 = vcmask 64512   ;;  %v678_v9 = vmov 0.0   ;;  %v223_v13 = vld [vmem:[%s851_s2 + $0x18] sm:$0xff]  ;;  %v222_v14 = vld [vmem:[%s851_s2 + $0x10] sm:$0xff] }
  0x14   : > { %611 = vset.pattern.permute.xlu0 %v677_v0  ;;  %612 = vset.pattern.permute.xlu1 %v677_v0  ;;  %v221_v15 = vld [vmem:[%s851_s2 + $0x8] sm:$0xff]  ;;  %v220_v18 = vld [vmem:[%s851_s2] sm:$0xff]  ;;  %v540_v19 = vld [vmem:[%s851_s2 + $0x38] sm:$0xff]  ;;  %vm224_vm4 = vcmask 261120   ;;  %vm248_vm6 = vcmask 125952  }
  0x15   : > { %s566_s25 = sshll.u32 %s178_s24, 4  ;;  %s530_s29 = sshll.u32 %s178_s24, 3  ;;  %v188_v7 = vand.u32 127, %v187_v6  ;;  %240 = vmatpush.msra.mxu1 %v223_v13  ;;  %301 = vmatpush.msra.mxu3 %v540_v19  ;;  %v539_v20 = vld [vmem:[%s851_s2 + $0x30] sm:$0xff]  ;;  %v538_v21 = vld [vmem:[%s851_s2 + $0x28] sm:$0xff]  ;;  %v537_v22 = vld [vmem:[%s851_s2 + $0x20] sm:$0xff] }
  0x16   : > { %s181_s28 = scalar_lea.vmem %s849_s0, %s566_s25  ;;  %s185_s5 = scalar_lea.vmem %s850_s1, %s530_s29  ;;  %v549_v23 = vld [vmem:[%s851_s2 + $0x58] sm:$0xff]  ;;  %v548_v24 = vld [vmem:[%s851_s2 + $0x50] sm:$0xff]  ;;  %v547_v25 = vld [vmem:[%s851_s2 + $0x48] sm:$0xff] }
  0x17   : > { %v189_v1 = vld [vmem:[%s181_s28] sm:$0xf]  ;;  %v534_v2 = vld [vmem:[%s181_s28 + $0x4] sm:$0xf]  ;;  %v543_v4 = vld [vmem:[%s181_s28 + $0x8] sm:$0xf]  ;;  %241 = vmatpush.msra.mxu1 %v222_v14  ;;  %302 = vmatpush.msra.mxu3 %v539_v20 }
  0x18   : > { %191 = vperm.xlu0 %611, %v189_v1   ;;  %v186_v3 = vld [vmem:[%s185_s5] sm:$0xff]  ;;  %314 = vperm.xlu1 %612, %v543_v4   ;;  %v552_v5 = vld [vmem:[%s181_s28 + $0xc] sm:$0xf]  ;;  %v558_v32 = vld [vmem:[%s851_s2 + $0x78] sm:$0xff]  ;;  %s174_s29 = sand.u32 1, %s667_s13   ;;  %s567_s5 = sshll.u32 %s722_s16, 4 }
  0x19   : > { %215 = vmatpush.msra.mxu0 %v186_v3  ;;  %276 = vmatpush.msra.mxu2 %v186_v3  ;;  %v546_v30 = vld [vmem:[%s851_s2 + $0x40] sm:$0xff]  ;;  %v557_v33 = vld [vmem:[%s851_s2 + $0x70] sm:$0xff]  ;;  %v556_v34 = vld [vmem:[%s851_s2 + $0x68] sm:$0xff]  ;;  %s527_s30 = sshll.u32 %s174_s29, 4  ;;  %s445_s8 = scalar_lea.hbm %s852_s3, %s567_s5 }
  0x1a   : > { %242 = vmatpush.msra.mxu1 %v221_v15  ;;  %303 = vmatpush.msra.mxu3 %v538_v21  ;;  %v555_v35 = vld [vmem:[%s851_s2 + $0x60] sm:$0xff]  ;;  %s176_s4 = scalar_lea.vmem [#allocation2], %s527_s30  ;;  %s448_s10 = sshll.u32 %s445_s8, 4  ;;  %s449_s10 = int_to_ptr.hbm [resolvable:$true] %s448_s10 }
  0x1b   : > { %337 = vmatpush.msrb.mxu0 %v186_v3  ;;  %362 = vmatpush.msrb.mxu2 %v549_v23  ;;  %s446_s9 = sshll.u32 %s176_s4, 4  ;;  %s434_s11 = scalar_lea.sflag [#allocation3], %s174_s29  ;;  %s447_s9 = int_to_ptr.vmem [resolvable:$true] %s446_s9 }
  0x1c   : > { %243 = vmatpush.msra.mxu1 %v220_v18  ;;  %304 = vmatpush.msra.mxu3 %v537_v22  ;;  %s627_s17 = sshra.s32 %s449_s10, 4  ;;  %s633_s24 = scalar_lea.hbm %s852_s3, 32  ;;  %s628_s17 = int_to_ptr.hbm [resolvable:$true] %s627_s17 }
  0x1d   : > { %363 = vmatpush.msrb.mxu2 %v548_v24  ;;  %s629_s19 = scalar_lea.hbm %s628_s17, 16  ;;  %p634_p0 = scmp.lt.s32.totalorder %s628_s17, %s852_s3 }
  0x1e   : > { %398 = vmatpush.msrb.mxu1 %v186_v3  ;;  %423 = vmatpush.msrb.mxu3 %v558_v32  ;;  %p630_p11 = scmp.ne.s32.totalorder %s628_s17, %s629_s19  ;;  %p635_p1 = scmp.lt.s32.totalorder %s633_s24, %s629_s19 }
  0x1f   : > { %364 = vmatpush.msrb.mxu2 %v547_v25 }
  0x20   : > { %253 = vperm.xlu0 %611, %v534_v2   ;;  %375 = vperm.xlu1 %612, %v552_v5   ;;  %p631_p12 = pnand %p630_p11, %p739_p5  ;;  %p636_p2 = por %p635_p1, %p634_p0 }
  0x21   : > { %365 = vmatpush.msrb.mxu2 %v546_v30  ;;  %424 = vmatpush.msrb.mxu3 %v557_v33 }
  0x22   : > { %p632_p13 = pneg %p631_p12 }
  0x23   : > { %425 = vmatpush.msrb.mxu3 %v556_v34 }
  0x24   : > { %p637_p3 = pnand %p636_p2, %p632_p13 }
  0x25   : > { %426 = vmatpush.msrb.mxu3 %v555_v35 }
  0x8a   : > { %v192_v8 = vpop.permute.xlu0 %191  ;;  %v315_v16 = vpop.permute.xlu1 %314 }
  0x8b   : > { %vm193_vm1 = vcmp.eq.s32.totalorder %v188_v7, %v192_v8  ;;  %vm316_vm3 = vcmp.eq.s32.totalorder %v188_v7, %v315_v16 }
  0x8c   : > { %v531_v10 = vsel %vm193_vm1, 1.0, %v678_v9  ;;  %v544_v17 = vsel %vm316_vm3, 1.0, %v678_v9 }
  0x8d   : > { %532 = vmatmul.msk.f32.vlgmr.msra.gmra.mxu0 %vm196_vm0, %v531_v10 }
  0x92   : > { %v254_v11 = vpop.permute.xlu0 %253  ;;  %v376_v27 = vpop.permute.xlu1 %375 }
  0x93   : > { %vm255_vm2 = vcmp.eq.s32.totalorder %v188_v7, %v254_v11  ;;  %vm377_vm5 = vcmp.eq.s32.totalorder %v188_v7, %v376_v27 }
  0x94   : > { %v535_v12 = vsel %vm255_vm2, 1.0, %v678_v9  ;;  %v553_v28 = vsel %vm377_vm5, 1.0, %v678_v9 }
  0x95   : > { %536 = vmatmul.msk.f32.vlgmr.msra.gmra.mxu2 %vm196_vm0, %v535_v12  ;;  %545 = vmatmul.msk.f32.vlgmr.msrb.gmra.mxu0 %vm196_vm0, %v544_v17 }
 0x10a   : > { %v217_v26 = vpop.f32.mrf.mxu0 }
 0x10b   : > { %533 = vmatmul.msk.f32.vlgmr.msra.gmra.mxu1 %vm224_vm4, %v217_v26 }
 0x112   : > { %v339_v31 = vpop.f32.mrf.mxu0 }
 0x113   : > { %554 = vmatmul.msk.f32.vlgmr.msrb.gmra.mxu1 %vm196_vm0, %v553_v28  ;;  %550 = vmatmul.msk.f32.vlgmr.msrb.gmra.mxu2 %vm224_vm4, %v339_v31 }
 0x118   : > { %v278_v29 = vpop.f32.mrf.mxu2 }
 0x119   : > { %541 = vmatmul.msk.f32.vlgmr.msra.gmra.mxu3 %vm224_vm4, %v278_v29 }
 0x188   : > { %v245_v36 = vpop.f32.mrf.mxu1 }
 0x189   : > { %249 = vst.msk [vmem:[%s176_s4] sm:$0xf] %vm248_vm6, %v245_v36 }
 0x190   : > { %v400_v37 = vpop.f32.mrf.mxu1 }
 0x191   : > { %559 = vmatmul.msk.f32.vlgmr.msrb.gmra.mxu3 %vm224_vm4, %v400_v37 }
 0x196   : > { %v367_v39 = vpop.f32.mrf.mxu2 }
 0x197   : > { %551 = vst.msk [vmem:[%s176_s4 + $0x8] sm:$0xf] %vm248_vm6, %v367_v39 }
 0x19c   : > { %v306_v38 = vpop.f32.mrf.mxu3 }
 0x19d   : > { %542 = vst.msk [vmem:[%s176_s4 + $0x4] sm:$0xf] %vm248_vm6, %v306_v38 }
 0x214   : > { %v428_v40 = vpop.f32.mrf.mxu3 }
 0x215   : > { %560 = vst.msk [vmem:[%s176_s4 + $0xc] sm:$0xf] %vm248_vm6, %v428_v40 }
 0x216   : > { %640 = shalt.err (!%p637_p3)
}
 0x217   : > { %s679_s27 = smov 64   ;;  %s680_s28 = smov 4  }
 0x218   : > { %568 = dma.vmem_to_hbm [thread:$0]  (%p739_p5), %s447_s9, 256, %s449_s10, %s434_s11, %s679_s27, %s679_s27, %s680_s28  }
 0x219 PF: > { %p574_p4 = scmp.ge.s32.totalorder %s675_s15, 2  ;;  %s463_s29 = sand.u32 1, %s663_s12  }
 0x21a   : > { %s464_s30 = scalar_lea.sflag [#allocation3], %s463_s29 }
 0x21b   : > { %p571_p7 = pnand %p574_p4, %p743_p6 }
 0x21d   : > { %p572_p8 = pneg %p571_p7 }
 0x21f   : > { %658 = dma.done.wait (%p572_p8), %s464_s30, 256  }
 0x220   : > { %660 = vsyncadd (%p572_p8), %s464_s30, 4294967040  ;;  %p13_p9 = scmp.ge.s32.totalorder %s726_s18, 4   ;;  %s855_s12 = smov %s667_s13 }
 0x221   : > { %s856_s13 = smov %s671_s14  ;;  %s857_s14 = smov %s737_s21 }
 0x222   : > { %s858_s15 = smov %s726_s18  ;;  %15 = sbr.rel (!%p13_p9) target bundleno = 3 (0x3), region = 79 }
 0x227   :  { %470 = vsyncpa [#allocation3], 1 }
 0x228   :  { %472 = vsyncpa [#allocation3 + $0x1], 1 }

</bundles_post_ra>
